<compile_context>
chip_gen: v7x
topology: tpu7x:2x2x1
jax: 0.10.0
libtpu: 0.0.40
codegen_flags: <defaults>
</compile_context>

<pallas_src>
import functools
import math

import jax
import jax.numpy as jnp
from jax.experimental import pallas as pl
from jax.experimental.pallas import tpu as pltpu


# Weights live in HBM as bf16 (halves DMA bytes + VMEM footprint) and the MXU
# runs bf16 x bf16 -> f32.  Elementwise math (LN, softmax, GELU, residuals)
# stays in f32.
WEIGHT_DTYPE = jnp.bfloat16
USE_BF16_MATMUL = True


def _mm(a, b):
    """MXU matmul, bf16 operands, f32 accumulation."""
    if USE_BF16_MATMUL:
        a = a.astype(jnp.bfloat16)
        b = b.astype(jnp.bfloat16)
    return jnp.dot(a, b, preferred_element_type=jnp.float32)


def _mm_nt(a, b):
    """a @ b.T without an explicit XLU transpose (contract last dims)."""
    if USE_BF16_MATMUL:
        a = a.astype(jnp.bfloat16)
        b = b.astype(jnp.bfloat16)
    return jax.lax.dot_general(
        a, b, dimension_numbers=(((1,), (1,)), ((), ())),
        preferred_element_type=jnp.float32)


def fused_block_kernel(
    x_ref,      # (bt, S, E)  f32  input activations (resident over the block axis)
    watt_ref,   # (1, H, Dh, Dh) bf16 per-head att-val weight (compact, no block-diag)
    wv_t_ref,   # (1, E, E)   bf16 value projection, pre-transposed (in, out)
    wo_hs_ref,  # (1, H, Dh, E) bf16 out-proj, pre-transposed and head-split
    w1_t_ref,   # (1, E, 4E)  bf16 MLP up, pre-transposed
    w2_t_ref,   # (1, 4E, E)  bf16 MLP down, pre-transposed
    vec_ref,    # (1, 8, E)   f32  rows: ln1_g, ln1_b, ln2_g, ln2_b, wv_b, wo_b, b2, 0
    b1_ref,     # (1, 1, 4E)  f32  MLP up bias
    o_ref,      # (bt, S, E)  f32  output; doubles as the VMEM-resident activation carry
    *, heads, head_dim, seq, bt, mlp_chunk,
):
    k = pl.program_id(1)              # transformer-block index (sequential axis)
    E = heads * head_dim
    H4 = 4 * E
    M = bt * seq

    # The out block index is constant across the block axis, so o_ref stays in
    # VMEM across k and carries the activation between blocks (no scratch).
    @pl.when(k == 0)
    def _():
        o_ref[...] = x_ref[...]

    x = o_ref[...].reshape(M, E)      # (M, E) f32; bt merges into sublanes (S % 8 == 0)

    vec = vec_ref[0]                  # (8, E) f32
    ln1_g, ln1_b = vec[0:1, :], vec[1:2, :]
    ln2_g, ln2_b = vec[2:3, :], vec[3:4, :]
    wv_b, wo_b, b2 = vec[4:5, :], vec[5:6, :], vec[6:7, :]
    b1 = b1_ref[0]                    # (1, 4E) f32

    watt = watt_ref[0]                # (H, Dh, Dh) bf16
    wv_t = wv_t_ref[0]                # (E, E)      bf16
    wo_hs = wo_hs_ref[0]              # (H, Dh, E)  bf16
    w1_t = w1_t_ref[0]                # (E, 4E)     bf16
    w2_t = w2_t_ref[0]                # (4E, E)     bf16

    def layernorm(v, g, b):
        mu = jnp.mean(v, axis=-1, keepdims=True)
        var = jnp.mean((v - mu) ** 2, axis=-1, keepdims=True)
        return (v - mu) * jax.lax.rsqrt(var + 1e-5) * g + b

    # ---- attention sub-block (pre-norm residual) ----
    xn = layernorm(x, ln1_g, ln1_b)                 # (M, E) f32
    vx = _mm(xn, wv_t) + wv_b                       # value projection, full M rows

    scale = 1.0 / math.sqrt(head_dim)
    # NOTE: heads/bt are small & static -> unrolled.  For heads >> 8 switch to
    # lax.fori_loop with modest unroll to cap vreg pressure.
    # NOTE: the sub-128-lane head slices below become fully lane-aligned once
    # head_dim >= 128 (realistic sizes); at tiny Dh they are unavoidable.
    attn_rows = []
    for b in range(bt):
        r0 = b * seq
        xn_b = xn[r0:r0 + seq, :]                   # (S, E)
        vx_b = vx[r0:r0 + seq, :]
        acc = None
        for h in range(heads):
            lo = h * head_dim
            hi = lo + head_dim
            xh = xn_b[:, lo:hi]                     # (S, Dh)
            p = _mm(xh, watt[h])                    # x_h @ W_h            (S, Dh)
            s = _mm_nt(p, xh) * scale               # (x_h W_h) x_h^T      (S, S)
            # NOTE: reference discards the masked_fill result -> NO causal mask.
            s = s - jnp.max(s, axis=-1, keepdims=True)
            e = jnp.exp(s)
            att = e * pl.reciprocal(jnp.sum(e, axis=-1, keepdims=True), approx=True)
            ctx = _mm(att, vx_b[:, lo:hi])          # (S, Dh)
            contrib = _mm(ctx, wo_hs[h])            # fold head into out-proj (S, E)
            acc = contrib if acc is None else acc + contrib
        attn_rows.append(acc)
    attn = attn_rows[0] if bt == 1 else jnp.concatenate(attn_rows, axis=0)

    x1 = attn + wo_b + x                            # residual

    # ---- MLP sub-block (pre-norm residual), chunked over the 4E hidden dim ----
    xn2 = layernorm(x1, ln2_g, ln2_b)
    out = x1 + b2
    for c0 in range(0, H4, mlp_chunk):              # static chunk loop
        c1 = min(c0 + mlp_chunk, H4)
        h1 = _mm(xn2, w1_t[:, c0:c1]) + b1[:, c0:c1]
        h1 = 0.5 * h1 * (1.0 + jax.lax.erf(h1 / math.sqrt(2.0)))   # exact GELU
        out = out + _mm(h1, w2_t[c0:c1, :])
    # Dropout(config.text_dropout) is identity at inference.

    o_ref[...] = out.reshape(bt, seq, E)            # carry; HBM writeback once per tile


def _pack_params(block_params, heads, weight_dtype=WEIGHT_DTYPE):
    """Stack per-block params, pre-transpose, head-split the out-proj, cast the
    big weights to bf16 for HBM residency, and pack the small E-sized vectors."""
    E = block_params[0]["wv_w"].shape[0]
    Dh = E // heads
    watt = jnp.stack([p["w_att_val"] for p in block_params])                 # (nblk,H,Dh,Dh)
    wv_t = jnp.stack([p["wv_w"].T for p in block_params])                    # (nblk,E,E)
    wo_hs = jnp.stack([p["wo_w"].T.reshape(heads, Dh, E) for p in block_params])  # (nblk,H,Dh,E)
    w1_t = jnp.stack([p["w1"].T for p in block_params])                      # (nblk,E,4E)
    w2_t = jnp.stack([p["w2"].T for p in block_params])                      # (nblk,4E,E)
    vecs = jnp.stack([
        jnp.stack([p["ln1_g"], p["ln1_b"], p["ln2_g"], p["ln2_b"],
                   p["wv_b"], p["wo_b"], p["b2"], jnp.zeros_like(p["b2"])])
        for p in block_params]).astype(jnp.float32)                          # (nblk,8,E)
    b1 = jnp.stack([p["b1"][None, :] for p in block_params]).astype(jnp.float32)
    return dict(watt=watt.astype(weight_dtype),
                wv_t=wv_t.astype(weight_dtype),
                wo_hs=wo_hs.astype(weight_dtype),
                w1_t=w1_t.astype(weight_dtype),
                w2_t=w2_t.astype(weight_dtype),
                vecs=vecs, b1=b1)


def text_att_val_masked_transformer(x, block_params, heads, *,
                                    batch_tile=None, mlp_chunk=512):
    """All blocks (nn.Sequential) in one fused pallas_call.

    grid = (batch_tiles, blocks): blocks is the sequential ("arbitrary") axis;
    weights are indexed by it only, so they stay VMEM-resident across the batch
    tile and are streamed once per tile window.  The batch-tile axis is the
    leading "parallel" axis (megacore)."""
    B, S, E = x.shape
    assert E % heads == 0
    Dh = E // heads
    H4 = 4 * E
    nblk = len(block_params)

    if batch_tile is None:
        # Expose a 2-way parallel axis for v7x megacore when B allows it.
        bt = B // 2 if (B % 2 == 0 and B >= 2) else B
    else:
        assert B % batch_tile == 0
        bt = batch_tile
    nbt = B // bt
    mlp_chunk = min(mlp_chunk, H4)

    packed = _pack_params(block_params, heads)
    kernel = functools.partial(fused_block_kernel, heads=heads, head_dim=Dh,
                               seq=S, bt=bt, mlp_chunk=mlp_chunk)

    # Explicit VMEM budget (double-buffered bf16 weight set + activations +
    # intermediates), clamped to 64 MiB so it is valid on every generation.
    wbytes = 2 * (heads * Dh * Dh + 2 * E * E + 8 * E * E) + 4 * (8 * E + H4)
    abytes = 4 * bt * S * E
    est = 2 * wbytes + 4 * abytes + 16 * bt * S * max(E, mlp_chunk)
    vmem_limit = int(min(max(2 * est, 32 << 20), 64 << 20))

    return pl.pallas_call(
        kernel,
        out_shape=jax.ShapeDtypeStruct((B, S, E), x.dtype),
        grid=(nbt, nblk),
        in_specs=[
            pl.BlockSpec((bt, S, E), lambda i, k: (i, 0, 0)),        # x (resident over k)
            pl.BlockSpec((1, heads, Dh, Dh), lambda i, k: (k, 0, 0, 0)),  # watt
            pl.BlockSpec((1, E, E), lambda i, k: (k, 0, 0)),         # wv_t
            pl.BlockSpec((1, heads, Dh, E), lambda i, k: (k, 0, 0, 0)),   # wo_hs
            pl.BlockSpec((1, E, H4), lambda i, k: (k, 0, 0)),        # w1_t
            pl.BlockSpec((1, H4, E), lambda i, k: (k, 0, 0)),        # w2_t
            pl.BlockSpec((1, 8, E), lambda i, k: (k, 0, 0)),         # packed LN/bias vectors
            pl.BlockSpec((1, 1, H4), lambda i, k: (k, 0, 0)),        # b1
        ],
        out_specs=pl.BlockSpec((bt, S, E), lambda i, k: (i, 0, 0)),  # resident carry
        compiler_params=pltpu.CompilerParams(
            dimension_semantics=("parallel", "arbitrary"),
            vmem_limit_bytes=vmem_limit),
    )(x, packed["watt"], packed["wv_t"], packed["wo_hs"],
      packed["w1_t"], packed["w2_t"], packed["vecs"], packed["b1"])


def init_block_params(key, E, heads):
    Dh = E // heads
    ks = jax.random.split(key, 9)
    bound_att = math.sqrt(6.0 / (Dh * Dh))      # kaiming_uniform_, a=0
    b_lin = 1.0 / math.sqrt(E)
    b_lin2 = 1.0 / math.sqrt(4 * E)
    return {
        "w_att_val": jax.random.uniform(ks[0], (heads, Dh, Dh), jnp.float32,
                                        -bound_att, bound_att),
        "wv_w": jax.random.normal(ks[1], (E, E), jnp.float32) * E ** -0.5,
        "wv_b": jax.random.uniform(ks[2], (E,), jnp.float32, -b_lin, b_lin),
        "wo_w": jax.random.normal(ks[3], (E, E), jnp.float32) * E ** -0.5,
        "wo_b": jax.random.uniform(ks[4], (E,), jnp.float32, -b_lin, b_lin),
        "ln1_g": jnp.ones((E,), jnp.float32),
        "ln1_b": jnp.zeros((E,), jnp.float32),
        "ln2_g": jnp.ones((E,), jnp.float32),
        "ln2_b": jnp.zeros((E,), jnp.float32),
        "w1": jax.random.normal(ks[5], (4 * E, E), jnp.float32) * E ** -0.5,
        "b1": jax.random.uniform(ks[6], (4 * E,), jnp.float32, -b_lin, b_lin),
        "w2": jax.random.normal(ks[7], (E, 4 * E), jnp.float32) * (4 * E) ** -0.5,
        "b2": jax.random.uniform(ks[8], (E,), jnp.float32, -b_lin2, b_lin2),
    }


# --------- pure-JAX reference for a sanity check ---------
def _ref_block(x, p, heads):
    B, S, E = x.shape
    Dh = E // heads

    def ln(v, g, b):
        mu = v.mean(-1, keepdims=True)
        var = ((v - mu) ** 2).mean(-1, keepdims=True)
        return (v - mu) / jnp.sqrt(var + 1e-5) * g + b

    res = x
    xn = ln(x, p["ln1_g"], p["ln1_b"])
    xh = xn.reshape(B, S, heads, Dh).transpose(0, 2, 1, 3)        # B,H,S,Dh
    att = jnp.einsum("bhsd,hde->bhse", xh, p["w_att_val"])
    att = jnp.einsum("bhse,bhte->bhst", att, xh) / math.sqrt(Dh)
    att = jax.nn.softmax(att, axis=-1)                            # no mask (ref bug)
    vx = xn @ p["wv_w"].T + p["wv_b"]
    vh = vx.reshape(B, S, heads, Dh).transpose(0, 2, 1, 3)
    o = jnp.einsum("bhst,bhtd->bhsd", att, vh).transpose(0, 2, 1, 3).reshape(B, S, E)
    o = o @ p["wo_w"].T + p["wo_b"]
    x1 = o + res
    xn2 = ln(x1, p["ln2_g"], p["ln2_b"])
    h1 = xn2 @ p["w1"].T + p["b1"]
    h1 = 0.5 * h1 * (1.0 + jax.lax.erf(h1 / math.sqrt(2.0)))
    h2 = h1 @ p["w2"].T + p["b2"]
    return h2 + x1


if __name__ == "__main__":
    B, SEQ, EMB, HEADS, BLOCKS = 2, 8, 32, 4, 2

    key = jax.random.PRNGKey(0)
    k_x, *k_blocks = jax.random.split(key, 1 + BLOCKS)
    x = jax.random.normal(k_x, (B, SEQ, EMB), jnp.float32)
    params = [init_block_params(k, EMB, HEADS) for k in k_blocks]

    out = text_att_val_masked_transformer(x, params, HEADS)
    out = jax.block_until_ready(out)

    # Reference in f32 with bf16-rounded weights (the kernel stores weights in
    # bf16 HBM).  Tolerance covers the bf16 MXU operand casts and the EUP
    # approx-reciprocal softmax denominator.
    def _quantize_weights(p):
        r = dict(p)
        for name in ("w_att_val", "wv_w", "wo_w", "w1", "w2"):
            r[name] = p[name].astype(jnp.bfloat16).astype(jnp.float32)
        return r

    ref = x
    for p in params:
        ref = _ref_block(ref, _quantize_weights(p), HEADS)

    assert out.shape == (B, SEQ, EMB)
    assert jnp.allclose(out, ref, atol=5e-2, rtol=5e-2), (
        f"mismatch vs reference, max abs diff = {float(jnp.max(jnp.abs(out - ref)))}")

    print("KERNEL_OK")
</pallas_src>

<mosaic_0001>
module attributes {stable_mosaic.version = 11 : i64} {
  func.func @fused_block_kernel(%arg0: i32, %arg1: i32, %arg2: memref<1x8x32xf32, #tpu.memory_space<vmem>>, %arg3: memref<1x4x8x8xbf16, #tpu.memory_space<vmem>>, %arg4: memref<1x32x32xbf16, #tpu.memory_space<vmem>>, %arg5: memref<1x4x8x32xbf16, #tpu.memory_space<vmem>>, %arg6: memref<1x32x128xbf16, #tpu.memory_space<vmem>>, %arg7: memref<1x128x32xbf16, #tpu.memory_space<vmem>>, %arg8: memref<1x8x32xf32, #tpu.memory_space<vmem>>, %arg9: memref<1x1x128xf32, #tpu.memory_space<vmem>>, %arg10: memref<1x8x32xf32, #tpu.memory_space<vmem>>) attributes {dimension_semantics = [#tpu.dimension_semantics<parallel>, #tpu.dimension_semantics<arbitrary>], iteration_bounds = array<i64: 2, 2>, scalar_prefetch = 0 : i64, scratch_operands = 0 : i64, tpu.core_type = #tpu.core_type<tc>, window_params = [{transform_indices = @transform_0, window_bounds = array<i64: 1, 8, 32>}, {transform_indices = @transform_1, window_bounds = array<i64: 1, 4, 8, 8>}, {transform_indices = @transform_2, window_bounds = array<i64: 1, 32, 32>}, {transform_indices = @transform_3, window_bounds = array<i64: 1, 4, 8, 32>}, {transform_indices = @transform_4, window_bounds = array<i64: 1, 32, 128>}, {transform_indices = @transform_5, window_bounds = array<i64: 1, 128, 32>}, {transform_indices = @transform_6, window_bounds = array<i64: 1, 8, 32>}, {transform_indices = @transform_7, window_bounds = array<i64: 1, 1, 128>}, {transform_indices = @transform_8, window_bounds = array<i64: 1, 8, 32>}]} {
    %c0_i32 = arith.constant 0 : i32
    %0 = arith.cmpi eq, %arg1, %c0_i32 : i32
    %1 = arith.extui %0 : i1 to i32
    %c0_i32_0 = arith.constant 0 : i32
    %2 = arith.cmpi ne, %1, %c0_i32_0 : i32
    scf.if %2 {
      %c0_72 = arith.constant 0 : index
      %c0_73 = arith.constant 0 : index
      %c0_74 = arith.constant 0 : index
      %211 = vector.load %arg2[%c0_72, %c0_73, %c0_74] : memref<1x8x32xf32, #tpu.memory_space<vmem>>, vector<1x8x32xf32>
      %c0_75 = arith.constant 0 : index
      %c0_76 = arith.constant 0 : index
      %c0_77 = arith.constant 0 : index
      %212 = vector.load %arg10[%c0_75, %c0_76, %c0_77] : memref<1x8x32xf32, #tpu.memory_space<vmem>>, vector<1x8x32xf32>
      tpu.vector_store %arg10[%c0_75, %c0_76, %c0_77], %211 {strides = array<i32>} : memref<1x8x32xf32, #tpu.memory_space<vmem>>, vector<1x8x32xf32>,
    } else {
    }
    %c0 = arith.constant 0 : index
    %c0_1 = arith.constant 0 : index
    %c0_2 = arith.constant 0 : index
    %3 = vector.load %arg10[%c0, %c0_1, %c0_2] : memref<1x8x32xf32, #tpu.memory_space<vmem>>, vector<1x8x32xf32>
    %4 = vector.shape_cast %3 : vector<1x8x32xf32> to vector<8x32xf32>
    %c0_3 = arith.constant 0 : index
    %c0_4 = arith.constant 0 : index
    %c0_5 = arith.constant 0 : index
    %5 = vector.load %arg8[%c0_3, %c0_4, %c0_5] : memref<1x8x32xf32, #tpu.memory_space<vmem>>, vector<1x8x32xf32>
    %6 = vector.shape_cast %5 : vector<1x8x32xf32> to vector<8x32xf32>
    %7 = vector.extract_strided_slice %6 {offsets = [0, 0], sizes = [1, 32], strides = [1, 1]} : vector<8x32xf32> to vector<1x32xf32>
    %8 = vector.extract_strided_slice %6 {offsets = [1, 0], sizes = [1, 32], strides = [1, 1]} : vector<8x32xf32> to vector<1x32xf32>
    %9 = vector.extract_strided_slice %6 {offsets = [2, 0], sizes = [1, 32], strides = [1, 1]} : vector<8x32xf32> to vector<1x32xf32>
    %10 = vector.extract_strided_slice %6 {offsets = [3, 0], sizes = [1, 32], strides = [1, 1]} : vector<8x32xf32> to vector<1x32xf32>
    %11 = vector.extract_strided_slice %6 {offsets = [4, 0], sizes = [1, 32], strides = [1, 1]} : vector<8x32xf32> to vector<1x32xf32>
    %12 = vector.extract_strided_slice %6 {offsets = [5, 0], sizes = [1, 32], strides = [1, 1]} : vector<8x32xf32> to vector<1x32xf32>
    %13 = vector.extract_strided_slice %6 {offsets = [6, 0], sizes = [1, 32], strides = [1, 1]} : vector<8x32xf32> to vector<1x32xf32>
    %c0_6 = arith.constant 0 : index
    %c0_7 = arith.constant 0 : index
    %c0_8 = arith.constant 0 : index
    %14 = vector.load %arg9[%c0_6, %c0_7, %c0_8] : memref<1x1x128xf32, #tpu.memory_space<vmem>>, vector<1x1x128xf32>
    %15 = vector.shape_cast %14 : vector<1x1x128xf32> to vector<1x128xf32>
    %c0_9 = arith.constant 0 : index
    %c0_10 = arith.constant 0 : index
    %c0_11 = arith.constant 0 : index
    %c0_12 = arith.constant 0 : index
    %16 = vector.load %arg3[%c0_9, %c0_10, %c0_11, %c0_12] : memref<1x4x8x8xbf16, #tpu.memory_space<vmem>>, vector<1x4x8x8xbf16>
    %17 = vector.shape_cast %16 : vector<1x4x8x8xbf16> to vector<4x8x8xbf16>
    %c0_13 = arith.constant 0 : index
    %c0_14 = arith.constant 0 : index
    %c0_15 = arith.constant 0 : index
    %18 = vector.load %arg4[%c0_13, %c0_14, %c0_15] : memref<1x32x32xbf16, #tpu.memory_space<vmem>>, vector<1x32x32xbf16>
    %19 = vector.shape_cast %18 : vector<1x32x32xbf16> to vector<32x32xbf16>
    %c0_16 = arith.constant 0 : index
    %c0_17 = arith.constant 0 : index
    %c0_18 = arith.constant 0 : index
    %c0_19 = arith.constant 0 : index
    %20 = vector.load %arg5[%c0_16, %c0_17, %c0_18, %c0_19] : memref<1x4x8x32xbf16, #tpu.memory_space<vmem>>, vector<1x4x8x32xbf16>
    %21 = vector.shape_cast %20 : vector<1x4x8x32xbf16> to vector<4x8x32xbf16>
    %c0_20 = arith.constant 0 : index
    %c0_21 = arith.constant 0 : index
    %c0_22 = arith.constant 0 : index
    %22 = vector.load %arg6[%c0_20, %c0_21, %c0_22] : memref<1x32x128xbf16, #tpu.memory_space<vmem>>, vector<1x32x128xbf16>
    %23 = vector.shape_cast %22 : vector<1x32x128xbf16> to vector<32x128xbf16>
    %c0_23 = arith.constant 0 : index
    %c0_24 = arith.constant 0 : index
    %c0_25 = arith.constant 0 : index
    %24 = vector.load %arg7[%c0_23, %c0_24, %c0_25] : memref<1x128x32xbf16, #tpu.memory_space<vmem>>, vector<1x128x32xbf16>
    %25 = vector.shape_cast %24 : vector<1x128x32xbf16> to vector<128x32xbf16>
    %cst = arith.constant dense<0.000000e+00> : vector<8xf32>
    %26 = vector.multi_reduction <add>, %4, %cst [1] : vector<8x32xf32> to vector<8xf32>
    %27 = vector.shape_cast %26 : vector<8xf32> to vector<8x1xf32>
    %cst_26 = arith.constant 3.200000e+01 : f32
    %28 = vector.broadcast %cst_26 : f32 to vector<8x1xf32>
    %29 = arith.divf %27, %28 : vector<8x1xf32>
    %30 = vector.broadcast %29 : vector<8x1xf32> to vector<8x32xf32>
    %31 = arith.subf %4, %30 : vector<8x32xf32>
    %32 = arith.mulf %31, %31 : vector<8x32xf32>
    %cst_27 = arith.constant dense<0.000000e+00> : vector<8xf32>
    %33 = vector.multi_reduction <add>, %32, %cst_27 [1] : vector<8x32xf32> to vector<8xf32>
    %34 = vector.shape_cast %33 : vector<8xf32> to vector<8x1xf32>
    %cst_28 = arith.constant 3.200000e+01 : f32
    %35 = vector.broadcast %cst_28 : f32 to vector<8x1xf32>
    %36 = arith.divf %34, %35 : vector<8x1xf32>
    %37 = vector.broadcast %29 : vector<8x1xf32> to vector<8x32xf32>
    %38 = arith.subf %4, %37 : vector<8x32xf32>
    %cst_29 = arith.constant 9.99999974E-6 : f32
    %39 = vector.broadcast %cst_29 : f32 to vector<8x1xf32>
    %40 = arith.addf %36, %39 : vector<8x1xf32>
    %41 = math.rsqrt %40 : vector<8x1xf32>
    %42 = vector.broadcast %41 : vector<8x1xf32> to vector<8x32xf32>
    %43 = arith.mulf %38, %42 : vector<8x32xf32>
    %44 = vector.broadcast %7 : vector<1x32xf32> to vector<8x32xf32>
    %45 = arith.mulf %43, %44 : vector<8x32xf32>
    %46 = vector.broadcast %8 : vector<1x32xf32> to vector<8x32xf32>
    %47 = arith.addf %45, %46 : vector<8x32xf32>
    %48 = arith.truncf %47 : vector<8x32xf32> to vector<8x32xbf16>
    %cst_30 = arith.constant dense<0.000000e+00> : vector<8x32xf32>
    %49 = tpu.matmul %48, %19, %cst_30 {dimension_numbers = #tpu.dot_dimension_numbers<[1], [0], [0], [1], [0, 0, 1, 1], [], []>} : vector<8x32xbf16>, vector<32x32xbf16>, vector<8x32xf32> -> vector<8x32xf32>
    %50 = vector.broadcast %11 : vector<1x32xf32> to vector<8x32xf32>
    %51 = arith.addf %49, %50 : vector<8x32xf32>
    %52 = vector.extract_strided_slice %47 {offsets = [0, 0], sizes = [8, 8], strides = [1, 1]} : vector<8x32xf32> to vector<8x8xf32>
    %53 = vector.extract_strided_slice %17 {offsets = [0, 0, 0], sizes = [1, 8, 8], strides = [1, 1, 1]} : vector<4x8x8xbf16> to vector<1x8x8xbf16>
    %54 = vector.shape_cast %53 : vector<1x8x8xbf16> to vector<8x8xbf16>
    %55 = arith.truncf %52 : vector<8x8xf32> to vector<8x8xbf16>
    %cst_31 = arith.constant dense<0.000000e+00> : vector<8x8xf32>
    %56 = tpu.matmul %55, %54, %cst_31 {dimension_numbers = #tpu.dot_dimension_numbers<[1], [0], [0], [1], [0, 0, 1, 1], [], []>} : vector<8x8xbf16>, vector<8x8xbf16>, vector<8x8xf32> -> vector<8x8xf32>
    %57 = arith.truncf %56 : vector<8x8xf32> to vector<8x8xbf16>
    %58 = arith.truncf %52 : vector<8x8xf32> to vector<8x8xbf16>
    %cst_32 = arith.constant dense<0.000000e+00> : vector<8x8xf32>
    %59 = tpu.matmul %57, %58, %cst_32 {dimension_numbers = #tpu.dot_dimension_numbers<[1], [1], [0], [0], [0, 0, 1, 0], [], []>} : vector<8x8xbf16>, vector<8x8xbf16>, vector<8x8xf32> -> vector<8x8xf32>
    %cst_33 = arith.constant 0.353553385 : f32
    %60 = vector.broadcast %cst_33 : f32 to vector<8x8xf32>
    %61 = arith.mulf %59, %60 : vector<8x8xf32>
    %cst_34 = arith.constant dense<0xFF800000> : vector<8xf32>
    %62 = vector.multi_reduction <maximumf>, %61, %cst_34 [1] : vector<8x8xf32> to vector<8xf32>
    %63 = vector.shape_cast %62 : vector<8xf32> to vector<8x1xf32>
    %64 = vector.broadcast %63 : vector<8x1xf32> to vector<8x8xf32>
    %65 = arith.subf %61, %64 : vector<8x8xf32>
    %66 = math.exp %65 : vector<8x8xf32>
    %cst_35 = arith.constant dense<0.000000e+00> : vector<8xf32>
    %67 = vector.multi_reduction <add>, %66, %cst_35 [1] : vector<8x8xf32> to vector<8xf32>
    %68 = vector.shape_cast %67 : vector<8xf32> to vector<8x1xf32>
    %69 = tpu.reciprocal %68 {approx = true} : vector<8x1xf32> -> vector<8x1xf32>
    %70 = vector.broadcast %69 : vector<8x1xf32> to vector<8x8xf32>
    %71 = arith.mulf %66, %70 : vector<8x8xf32>
    %72 = vector.extract_strided_slice %51 {offsets = [0, 0], sizes = [8, 8], strides = [1, 1]} : vector<8x32xf32> to vector<8x8xf32>
    %73 = arith.truncf %71 : vector<8x8xf32> to vector<8x8xbf16>
    %74 = arith.truncf %72 : vector<8x8xf32> to vector<8x8xbf16>
    %cst_36 = arith.constant dense<0.000000e+00> : vector<8x8xf32>
    %75 = tpu.matmul %73, %74, %cst_36 {dimension_numbers = #tpu.dot_dimension_numbers<[1], [0], [0], [1], [0, 0, 1, 1], [], []>} : vector<8x8xbf16>, vector<8x8xbf16>, vector<8x8xf32> -> vector<8x8xf32>
    %76 = vector.extract_strided_slice %21 {offsets = [0, 0, 0], sizes = [1, 8, 32], strides = [1, 1, 1]} : vector<4x8x32xbf16> to vector<1x8x32xbf16>
    %77 = vector.shape_cast %76 : vector<1x8x32xbf16> to vector<8x32xbf16>
    %78 = arith.truncf %75 : vector<8x8xf32> to vector<8x8xbf16>
    %cst_37 = arith.constant dense<0.000000e+00> : vector<8x32xf32>
    %79 = tpu.matmul %78, %77, %cst_37 {dimension_numbers = #tpu.dot_dimension_numbers<[1], [0], [0], [1], [0, 0, 1, 1], [], []>} : vector<8x8xbf16>, vector<8x32xbf16>, vector<8x32xf32> -> vector<8x32xf32>
    %80 = vector.extract_strided_slice %47 {offsets = [0, 8], sizes = [8, 8], strides = [1, 1]} : vector<8x32xf32> to vector<8x8xf32>
    %81 = vector.extract_strided_slice %17 {offsets = [1, 0, 0], sizes = [1, 8, 8], strides = [1, 1, 1]} : vector<4x8x8xbf16> to vector<1x8x8xbf16>
    %82 = vector.shape_cast %81 : vector<1x8x8xbf16> to vector<8x8xbf16>
    %83 = arith.truncf %80 : vector<8x8xf32> to vector<8x8xbf16>
    %cst_38 = arith.constant dense<0.000000e+00> : vector<8x8xf32>
    %84 = tpu.matmul %83, %82, %cst_38 {dimension_numbers = #tpu.dot_dimension_numbers<[1], [0], [0], [1], [0, 0, 1, 1], [], []>} : vector<8x8xbf16>, vector<8x8xbf16>, vector<8x8xf32> -> vector<8x8xf32>
    %85 = arith.truncf %84 : vector<8x8xf32> to vector<8x8xbf16>
    %86 = arith.truncf %80 : vector<8x8xf32> to vector<8x8xbf16>
    %cst_39 = arith.constant dense<0.000000e+00> : vector<8x8xf32>
    %87 = tpu.matmul %85, %86, %cst_39 {dimension_numbers = #tpu.dot_dimension_numbers<[1], [1], [0], [0], [0, 0, 1, 0], [], []>} : vector<8x8xbf16>, vector<8x8xbf16>, vector<8x8xf32> -> vector<8x8xf32>
    %cst_40 = arith.constant 0.353553385 : f32
    %88 = vector.broadcast %cst_40 : f32 to vector<8x8xf32>
    %89 = arith.mulf %87, %88 : vector<8x8xf32>
    %cst_41 = arith.constant dense<0xFF800000> : vector<8xf32>
    %90 = vector.multi_reduction <maximumf>, %89, %cst_41 [1] : vector<8x8xf32> to vector<8xf32>
    %91 = vector.shape_cast %90 : vector<8xf32> to vector<8x1xf32>
    %92 = vector.broadcast %91 : vector<8x1xf32> to vector<8x8xf32>
    %93 = arith.subf %89, %92 : vector<8x8xf32>
    %94 = math.exp %93 : vector<8x8xf32>
    %cst_42 = arith.constant dense<0.000000e+00> : vector<8xf32>
    %95 = vector.multi_reduction <add>, %94, %cst_42 [1] : vector<8x8xf32> to vector<8xf32>
    %96 = vector.shape_cast %95 : vector<8xf32> to vector<8x1xf32>
    %97 = tpu.reciprocal %96 {approx = true} : vector<8x1xf32> -> vector<8x1xf32>
    %98 = vector.broadcast %97 : vector<8x1xf32> to vector<8x8xf32>
    %99 = arith.mulf %94, %98 : vector<8x8xf32>
    %100 = vector.extract_strided_slice %51 {offsets = [0, 8], sizes = [8, 8], strides = [1, 1]} : vector<8x32xf32> to vector<8x8xf32>
    %101 = arith.truncf %99 : vector<8x8xf32> to vector<8x8xbf16>
    %102 = arith.truncf %100 : vector<8x8xf32> to vector<8x8xbf16>
    %cst_43 = arith.constant dense<0.000000e+00> : vector<8x8xf32>
    %103 = tpu.matmul %101, %102, %cst_43 {dimension_numbers = #tpu.dot_dimension_numbers<[1], [0], [0], [1], [0, 0, 1, 1], [], []>} : vector<8x8xbf16>, vector<8x8xbf16>, vector<8x8xf32> -> vector<8x8xf32>
    %104 = vector.extract_strided_slice %21 {offsets = [1, 0, 0], sizes = [1, 8, 32], strides = [1, 1, 1]} : vector<4x8x32xbf16> to vector<1x8x32xbf16>
    %105 = vector.shape_cast %104 : vector<1x8x32xbf16> to vector<8x32xbf16>
    %106 = arith.truncf %103 : vector<8x8xf32> to vector<8x8xbf16>
    %cst_44 = arith.constant dense<0.000000e+00> : vector<8x32xf32>
    %107 = tpu.matmul %106, %105, %cst_44 {dimension_numbers = #tpu.dot_dimension_numbers<[1], [0], [0], [1], [0, 0, 1, 1], [], []>} : vector<8x8xbf16>, vector<8x32xbf16>, vector<8x32xf32> -> vector<8x32xf32>
    %108 = arith.addf %79, %107 : vector<8x32xf32>
    %109 = vector.extract_strided_slice %47 {offsets = [0, 16], sizes = [8, 8], strides = [1, 1]} : vector<8x32xf32> to vector<8x8xf32>
    %110 = vector.extract_strided_slice %17 {offsets = [2, 0, 0], sizes = [1, 8, 8], strides = [1, 1, 1]} : vector<4x8x8xbf16> to vector<1x8x8xbf16>
    %111 = vector.shape_cast %110 : vector<1x8x8xbf16> to vector<8x8xbf16>
    %112 = arith.truncf %109 : vector<8x8xf32> to vector<8x8xbf16>
    %cst_45 = arith.constant dense<0.000000e+00> : vector<8x8xf32>
    %113 = tpu.matmul %112, %111, %cst_45 {dimension_numbers = #tpu.dot_dimension_numbers<[1], [0], [0], [1], [0, 0, 1, 1], [], []>} : vector<8x8xbf16>, vector<8x8xbf16>, vector<8x8xf32> -> vector<8x8xf32>
    %114 = arith.truncf %113 : vector<8x8xf32> to vector<8x8xbf16>
    %115 = arith.truncf %109 : vector<8x8xf32> to vector<8x8xbf16>
    %cst_46 = arith.constant dense<0.000000e+00> : vector<8x8xf32>
    %116 = tpu.matmul %114, %115, %cst_46 {dimension_numbers = #tpu.dot_dimension_numbers<[1], [1], [0], [0], [0, 0, 1, 0], [], []>} : vector<8x8xbf16>, vector<8x8xbf16>, vector<8x8xf32> -> vector<8x8xf32>
    %cst_47 = arith.constant 0.353553385 : f32
    %117 = vector.broadcast %cst_47 : f32 to vector<8x8xf32>
    %118 = arith.mulf %116, %117 : vector<8x8xf32>
    %cst_48 = arith.constant dense<0xFF800000> : vector<8xf32>
    %119 = vector.multi_reduction <maximumf>, %118, %cst_48 [1] : vector<8x8xf32> to vector<8xf32>
    %120 = vector.shape_cast %119 : vector<8xf32> to vector<8x1xf32>
    %121 = vector.broadcast %120 : vector<8x1xf32> to vector<8x8xf32>
    %122 = arith.subf %118, %121 : vector<8x8xf32>
    %123 = math.exp %122 : vector<8x8xf32>
    %cst_49 = arith.constant dense<0.000000e+00> : vector<8xf32>
    %124 = vector.multi_reduction <add>, %123, %cst_49 [1] : vector<8x8xf32> to vector<8xf32>
    %125 = vector.shape_cast %124 : vector<8xf32> to vector<8x1xf32>
    %126 = tpu.reciprocal %125 {approx = true} : vector<8x1xf32> -> vector<8x1xf32>
    %127 = vector.broadcast %126 : vector<8x1xf32> to vector<8x8xf32>
    %128 = arith.mulf %123, %127 : vector<8x8xf32>
    %129 = vector.extract_strided_slice %51 {offsets = [0, 16], sizes = [8, 8], strides = [1, 1]} : vector<8x32xf32> to vector<8x8xf32>
    %130 = arith.truncf %128 : vector<8x8xf32> to vector<8x8xbf16>
    %131 = arith.truncf %129 : vector<8x8xf32> to vector<8x8xbf16>
    %cst_50 = arith.constant dense<0.000000e+00> : vector<8x8xf32>
    %132 = tpu.matmul %130, %131, %cst_50 {dimension_numbers = #tpu.dot_dimension_numbers<[1], [0], [0], [1], [0, 0, 1, 1], [], []>} : vector<8x8xbf16>, vector<8x8xbf16>, vector<8x8xf32> -> vector<8x8xf32>
    %133 = vector.extract_strided_slice %21 {offsets = [2, 0, 0], sizes = [1, 8, 32], strides = [1, 1, 1]} : vector<4x8x32xbf16> to vector<1x8x32xbf16>
    %134 = vector.shape_cast %133 : vector<1x8x32xbf16> to vector<8x32xbf16>
    %135 = arith.truncf %132 : vector<8x8xf32> to vector<8x8xbf16>
    %cst_51 = arith.constant dense<0.000000e+00> : vector<8x32xf32>
    %136 = tpu.matmul %135, %134, %cst_51 {dimension_numbers = #tpu.dot_dimension_numbers<[1], [0], [0], [1], [0, 0, 1, 1], [], []>} : vector<8x8xbf16>, vector<8x32xbf16>, vector<8x32xf32> -> vector<8x32xf32>
    %137 = arith.addf %108, %136 : vector<8x32xf32>
    %138 = vector.extract_strided_slice %47 {offsets = [0, 24], sizes = [8, 8], strides = [1, 1]} : vector<8x32xf32> to vector<8x8xf32>
    %139 = vector.extract_strided_slice %17 {offsets = [3, 0, 0], sizes = [1, 8, 8], strides = [1, 1, 1]} : vector<4x8x8xbf16> to vector<1x8x8xbf16>
    %140 = vector.shape_cast %139 : vector<1x8x8xbf16> to vector<8x8xbf16>
    %141 = arith.truncf %138 : vector<8x8xf32> to vector<8x8xbf16>
    %cst_52 = arith.constant dense<0.000000e+00> : vector<8x8xf32>
    %142 = tpu.matmul %141, %140, %cst_52 {dimension_numbers = #tpu.dot_dimension_numbers<[1], [0], [0], [1], [0, 0, 1, 1], [], []>} : vector<8x8xbf16>, vector<8x8xbf16>, vector<8x8xf32> -> vector<8x8xf32>
    %143 = arith.truncf %142 : vector<8x8xf32> to vector<8x8xbf16>
    %144 = arith.truncf %138 : vector<8x8xf32> to vector<8x8xbf16>
    %cst_53 = arith.constant dense<0.000000e+00> : vector<8x8xf32>
    %145 = tpu.matmul %143, %144, %cst_53 {dimension_numbers = #tpu.dot_dimension_numbers<[1], [1], [0], [0], [0, 0, 1, 0], [], []>} : vector<8x8xbf16>, vector<8x8xbf16>, vector<8x8xf32> -> vector<8x8xf32>
    %cst_54 = arith.constant 0.353553385 : f32
    %146 = vector.broadcast %cst_54 : f32 to vector<8x8xf32>
    %147 = arith.mulf %145, %146 : vector<8x8xf32>
    %cst_55 = arith.constant dense<0xFF800000> : vector<8xf32>
    %148 = vector.multi_reduction <maximumf>, %147, %cst_55 [1] : vector<8x8xf32> to vector<8xf32>
    %149 = vector.shape_cast %148 : vector<8xf32> to vector<8x1xf32>
    %150 = vector.broadcast %149 : vector<8x1xf32> to vector<8x8xf32>
    %151 = arith.subf %147, %150 : vector<8x8xf32>
    %152 = math.exp %151 : vector<8x8xf32>
    %cst_56 = arith.constant dense<0.000000e+00> : vector<8xf32>
    %153 = vector.multi_reduction <add>, %152, %cst_56 [1] : vector<8x8xf32> to vector<8xf32>
    %154 = vector.shape_cast %153 : vector<8xf32> to vector<8x1xf32>
    %155 = tpu.reciprocal %154 {approx = true} : vector<8x1xf32> -> vector<8x1xf32>
    %156 = vector.broadcast %155 : vector<8x1xf32> to vector<8x8xf32>
    %157 = arith.mulf %152, %156 : vector<8x8xf32>
    %158 = vector.extract_strided_slice %51 {offsets = [0, 24], sizes = [8, 8], strides = [1, 1]} : vector<8x32xf32> to vector<8x8xf32>
    %159 = arith.truncf %157 : vector<8x8xf32> to vector<8x8xbf16>
    %160 = arith.truncf %158 : vector<8x8xf32> to vector<8x8xbf16>
    %cst_57 = arith.constant dense<0.000000e+00> : vector<8x8xf32>
    %161 = tpu.matmul %159, %160, %cst_57 {dimension_numbers = #tpu.dot_dimension_numbers<[1], [0], [0], [1], [0, 0, 1, 1], [], []>} : vector<8x8xbf16>, vector<8x8xbf16>, vector<8x8xf32> -> vector<8x8xf32>
    %162 = vector.extract_strided_slice %21 {offsets = [3, 0, 0], sizes = [1, 8, 32], strides = [1, 1, 1]} : vector<4x8x32xbf16> to vector<1x8x32xbf16>
    %163 = vector.shape_cast %162 : vector<1x8x32xbf16> to vector<8x32xbf16>
    %164 = arith.truncf %161 : vector<8x8xf32> to vector<8x8xbf16>
    %cst_58 = arith.constant dense<0.000000e+00> : vector<8x32xf32>
    %165 = tpu.matmul %164, %163, %cst_58 {dimension_numbers = #tpu.dot_dimension_numbers<[1], [0], [0], [1], [0, 0, 1, 1], [], []>} : vector<8x8xbf16>, vector<8x32xbf16>, vector<8x32xf32> -> vector<8x32xf32>
    %166 = arith.addf %137, %165 : vector<8x32xf32>
    %167 = vector.broadcast %12 : vector<1x32xf32> to vector<8x32xf32>
    %168 = arith.addf %166, %167 : vector<8x32xf32>
    %169 = arith.addf %168, %4 : vector<8x32xf32>
    %cst_59 = arith.constant dense<0.000000e+00> : vector<8xf32>
    %170 = vector.multi_reduction <add>, %169, %cst_59 [1] : vector<8x32xf32> to vector<8xf32>
    %171 = vector.shape_cast %170 : vector<8xf32> to vector<8x1xf32>
    %cst_60 = arith.constant 3.200000e+01 : f32
    %172 = vector.broadcast %cst_60 : f32 to vector<8x1xf32>
    %173 = arith.divf %171, %172 : vector<8x1xf32>
    %174 = vector.broadcast %173 : vector<8x1xf32> to vector<8x32xf32>
    %175 = arith.subf %169, %174 : vector<8x32xf32>
    %176 = arith.mulf %175, %175 : vector<8x32xf32>
    %cst_61 = arith.constant dense<0.000000e+00> : vector<8xf32>
    %177 = vector.multi_reduction <add>, %176, %cst_61 [1] : vector<8x32xf32> to vector<8xf32>
    %178 = vector.shape_cast %177 : vector<8xf32> to vector<8x1xf32>
    %cst_62 = arith.constant 3.200000e+01 : f32
    %179 = vector.broadcast %cst_62 : f32 to vector<8x1xf32>
    %180 = arith.divf %178, %179 : vector<8x1xf32>
    %181 = vector.broadcast %173 : vector<8x1xf32> to vector<8x32xf32>
    %182 = arith.subf %169, %181 : vector<8x32xf32>
    %cst_63 = arith.constant 9.99999974E-6 : f32
    %183 = vector.broadcast %cst_63 : f32 to vector<8x1xf32>
    %184 = arith.addf %180, %183 : vector<8x1xf32>
    %185 = math.rsqrt %184 : vector<8x1xf32>
    %186 = vector.broadcast %185 : vector<8x1xf32> to vector<8x32xf32>
    %187 = arith.mulf %182, %186 : vector<8x32xf32>
    %188 = vector.broadcast %9 : vector<1x32xf32> to vector<8x32xf32>
    %189 = arith.mulf %187, %188 : vector<8x32xf32>
    %190 = vector.broadcast %10 : vector<1x32xf32> to vector<8x32xf32>
    %191 = arith.addf %189, %190 : vector<8x32xf32>
    %192 = vector.broadcast %13 : vector<1x32xf32> to vector<8x32xf32>
    %193 = arith.addf %169, %192 : vector<8x32xf32>
    %194 = arith.truncf %191 : vector<8x32xf32> to vector<8x32xbf16>
    %cst_64 = arith.constant dense<0.000000e+00> : vector<8x128xf32>
    %195 = tpu.matmul %194, %23, %cst_64 {dimension_numbers = #tpu.dot_dimension_numbers<[1], [0], [0], [1], [0, 0, 1, 1], [], []>} : vector<8x32xbf16>, vector<32x128xbf16>, vector<8x128xf32> -> vector<8x128xf32>
    %196 = vector.broadcast %15 : vector<1x128xf32> to vector<8x128xf32>
    %197 = arith.addf %195, %196 : vector<8x128xf32>
    %cst_65 = arith.constant 5.000000e-01 : f32
    %198 = vector.broadcast %cst_65 : f32 to vector<8x128xf32>
    %199 = arith.mulf %198, %197 : vector<8x128xf32>
    %cst_66 = arith.constant 1.41421354 : f32
    %200 = vector.broadcast %cst_66 : f32 to vector<8x128xf32>
    %201 = arith.divf %197, %200 : vector<8x128xf32>
    %202 = math.erf %201 : vector<8x128xf32>
    %cst_67 = arith.constant 1.000000e+00 : f32
    %203 = vector.broadcast %cst_67 : f32 to vector<8x128xf32>
    %204 = arith.addf %203, %202 : vector<8x128xf32>
    %205 = arith.mulf %199, %204 : vector<8x128xf32>
    %206 = arith.truncf %205 : vector<8x128xf32> to vector<8x128xbf16>
    %cst_68 = arith.constant dense<0.000000e+00> : vector<8x32xf32>
    %207 = tpu.matmul %206, %25, %cst_68 {dimension_numbers = #tpu.dot_dimension_numbers<[1], [0], [0], [1], [0, 0, 1, 1], [], []>} : vector<8x128xbf16>, vector<128x32xbf16>, vector<8x32xf32> -> vector<8x32xf32>
    %208 = arith.addf %193, %207 : vector<8x32xf32>
    %209 = vector.shape_cast %208 : vector<8x32xf32> to vector<1x8x32xf32>
    %c0_69 = arith.constant 0 : index
    %c0_70 = arith.constant 0 : index
    %c0_71 = arith.constant 0 : index
    %210 = vector.load %arg10[%c0_69, %c0_70, %c0_71] : memref<1x8x32xf32, #tpu.memory_space<vmem>>, vector<1x8x32xf32>
    tpu.vector_store %arg10[%c0_69, %c0_70, %c0_71], %209 {strides = array<i32>} : memref<1x8x32xf32, #tpu.memory_space<vmem>>, vector<1x8x32xf32>,
    return
  }
  func.func @transform_0(%arg0: i32, %arg1: i32) -> (i32, i32, i32) {
    %c0_i32 = arith.constant 0 : i32
    %c0_i32_0 = arith.constant 0 : i32
    %c0_i32_1 = arith.constant 0 : i32
    return %arg0, %c0_i32, %c0_i32_0 : i32, i32, i32
  }
  func.func @transform_1(%arg0: i32, %arg1: i32) -> (i32, i32, i32, i32) {
    %c0_i32 = arith.constant 0 : i32
    %c0_i32_0 = arith.constant 0 : i32
    %c0_i32_1 = arith.constant 0 : i32
    %c0_i32_2 = arith.constant 0 : i32
    return %arg1, %c0_i32, %c0_i32_0, %c0_i32_1 : i32, i32, i32, i32
  }
  func.func @transform_2(%arg0: i32, %arg1: i32) -> (i32, i32, i32) {
    %c0_i32 = arith.constant 0 : i32
    %c0_i32_0 = arith.constant 0 : i32
    %c0_i32_1 = arith.constant 0 : i32
    return %arg1, %c0_i32, %c0_i32_0 : i32, i32, i32
  }
  func.func @transform_3(%arg0: i32, %arg1: i32) -> (i32, i32, i32, i32) {
    %c0_i32 = arith.constant 0 : i32
    %c0_i32_0 = arith.constant 0 : i32
    %c0_i32_1 = arith.constant 0 : i32
    %c0_i32_2 = arith.constant 0 : i32
    return %arg1, %c0_i32, %c0_i32_0, %c0_i32_1 : i32, i32, i32, i32
  }
  func.func @transform_4(%arg0: i32, %arg1: i32) -> (i32, i32, i32) {
    %c0_i32 = arith.constant 0 : i32
    %c0_i32_0 = arith.constant 0 : i32
    %c0_i32_1 = arith.constant 0 : i32
    return %arg1, %c0_i32, %c0_i32_0 : i32, i32, i32
  }
  func.func @transform_5(%arg0: i32, %arg1: i32) -> (i32, i32, i32) {
    %c0_i32 = arith.constant 0 : i32
    %c0_i32_0 = arith.constant 0 : i32
    %c0_i32_1 = arith.constant 0 : i32
    return %arg1, %c0_i32, %c0_i32_0 : i32, i32, i32
  }
  func.func @transform_6(%arg0: i32, %arg1: i32) -> (i32, i32, i32) {
    %c0_i32 = arith.constant 0 : i32
    %c0_i32_0 = arith.constant 0 : i32
    %c0_i32_1 = arith.constant 0 : i32
    return %arg1, %c0_i32, %c0_i32_0 : i32, i32, i32
  }
  func.func @transform_7(%arg0: i32, %arg1: i32) -> (i32, i32, i32) {
    %c0_i32 = arith.constant 0 : i32
    %c0_i32_0 = arith.constant 0 : i32
    %c0_i32_1 = arith.constant 0 : i32
    return %arg1, %c0_i32, %c0_i32_0 : i32, i32, i32
  }
  func.func @transform_8(%arg0: i32, %arg1: i32) -> (i32, i32, i32) {
    %c0_i32 = arith.constant 0 : i32
    %c0_i32_0 = arith.constant 0 : i32
    %c0_i32_1 = arith.constant 0 : i32
    return %arg0, %c0_i32, %c0_i32_0 : i32, i32, i32
  }
}

</mosaic_0001>

<bundles_post_ra>
// kernel: tpu_custom_call.1
= control target key start
LH: loop header
LB: loop body
LE: loop exit
PB: predicated region body
PF: predicated region fallthrough
CT: control target
= control target key end

     0   :  { %s2601_s0 = inlined_call_operand.vmem [shape: f32[2,8,32], index: 0, kind: input, shape index: {}]   ;;  %s2602_s1 = inlined_call_operand.vmem [shape: bf16[2,4,8,8], index: 1, kind: input, shape index: {}]   ;;  %s2603_s2 = inlined_call_operand.vmem [shape: bf16[2,32,32], index: 2, kind: input, shape index: {}]   ;;  %s2604_s3 = inlined_call_operand.vmem [shape: bf16[2,4,8,32], index: 3, kind: input, shape index: {}]   ;;  %s2605_s4 = inlined_call_operand.vmem [shape: bf16[2,32,128], index: 4, kind: input, shape index: {}]   ;;  %s2606_s5 = inlined_call_operand.vmem [shape: bf16[2,128,32], index: 5, kind: input, shape index: {}]   ;;  %s2607_s6 = inlined_call_operand.vmem [shape: f32[2,8,32], index: 6, kind: input, shape index: {}]   ;;  %s2608_s7 = inlined_call_operand.vmem [shape: f32[2,1,128], index: 7, kind: input, shape index: {}]   ;;  %s2609_s8 = inlined_call_operand.hbm [shape: f32[2,8,32], index: 8, kind: output, shape index: {}]  }
   0x1   :  { %2619 = sst [smem:[#allocation14_spill]] %s2601_s0 }
   0x2   :  { %2620 = sst [smem:[#allocation15_spill]] %s2602_s1 }
   0x3   :  { %2621 = sst [smem:[#allocation16_spill]] %s2603_s2 }
   0x4   :  { %2622 = sst [smem:[#allocation17_spill]] %s2604_s3 }
   0x5   :  { %13 = vsyncpa [#allocation3], 0 }
   0x6   :  { %15 = vsyncpa [#allocation3 + $0x1], 0  ;;  %s2227_s27 = smov 0   ;;  %s2229_s28 = smov 0  }
   0x7   :  { %s2231_s29 = smov 0   ;;  %s2233_s30 = smov 0  }
   0x8   :  { %s2235_s9 = smov 0   ;;  %s2237_s10 = smov 0  }
   0x9   :  { %s2239_s11 = smov 0   ;;  %s2241_s12 = smov 0  }
   0xa LB: > { %2623 = sst [smem:[#allocation5_spill]] %s2146_s27  ;;  %s1732_s13 = sadd.s32 4294967295, %s2174_s12   ;;  %s2174_s12 = sphi %s2241_s12, %s21_s12   ;;  %s2170_s11 = sphi %s2239_s11, %s2650_s11   ;;  %s2166_s10 = sphi %s2237_s10, %s2646_s10   ;;  %s2162_s9 = sphi %s2235_s9, %s2645_s9   ;;  %s2158_s30 = sphi %s2233_s30, %s2644_s30   ;;  %s2154_s29 = sphi %s2231_s29, %s2643_s29   ;;  %s2150_s28 = sphi %s2229_s28, %s2649_s28   ;;  %s2146_s27 = sphi %s2227_s27, %s2648_s27  }
   0xb   : > { %2624 = sst [smem:[#allocation6_spill]] %s2154_s29  ;;  %s1733_s14 = sadd.s32 4294967294, %s2174_s12  }
   0xc   : > { %2625 = sst [smem:[#allocation7_spill]] %s2166_s10  ;;  %s30_s15 = sadd.s32 1, %s2166_s10 }
   0xd   : > { %2626 = sst [smem:[#allocation8_spill]] %s2170_s11  ;;  %p31_p0 = scmp.ge.s32.totalorder %s30_s15, 2 }
   0xe   : > { %2627 = sst [smem:[#allocation9_spill]] %s2174_s12  ;;  %s33_s16 = sadd.s32 1, %s2170_s11 }
   0xf   : > { %p258_p1 = scmp.ne.s32.totalorder %s2154_s29, %s2150_s28  ;;  %p259_p2 = scmp.eq.s32.totalorder %s1732_s13, 3 }
  0x10   : > { %s2652_s15 = smov (%p31_p0, %s30_s15), 0  ;;  %s2654_s16 = smov (!%p31_p0, %s33_s16), %s2170_s11 }
  0x11   : > { %2628 = sst [smem:[#allocation10_spill]] %s2652_s15  ;;  %p2276_p3 = por %p259_p2, %p258_p1 }
  0x12   : > { %p264_p4 = scmp.ne.s32.totalorder %s2150_s28, %s2146_s27  ;;  %p35_p5 = scmp.ge.s32.totalorder %s2654_s16, 2 }
  0x13   : > { %p265_p6 = scmp.eq.s32.totalorder %s1733_s14, 3  ;;  %p1736_p7 = scmp.ge.s32.totalorder %s2174_s12, 1 }
  0x14   : > { %p343_p8 = scmp.lt.s32.totalorder %s2174_s12, 5  ;;  %s2656_s16 = smov (%p35_p5, %s2654_s16), 0 }
  0x15   : > { %2630 = sst [smem:[#allocation11_spill]] %s2656_s16  ;;  %p2286_p9 = por %p265_p6, %p264_p4 }
  0x16   : > { %p344_p10 = pnand %p1736_p7, %p343_p8  ;;  %s245_s19 = ssub.s32 %s2170_s11, %s2656_s16 }
  0x17   : > { %s2631_s18 = scalar_select %p2286_p9, 1, 0 }
  0x18   : > { %s248_s20 = sadd.s32 1, %s2154_s29  ;;  %p246_p11 = scmp.eq.s32.totalorder %s245_s19, 0 }
  0x19   : > { %2632 = sst [smem:[#allocation12_spill]] %s2631_s18  ;;  %347 = sbr.rel (%p344_p10) target bundleno = 4580 (0x11e4), region = 52 }
  0x1a   : > { %s2294_s21 = scalar_select %p246_p11, %s2154_s29, %s248_s20  }
  0x1b   : > { %s2612_s22 = sand.u32 (!%p344_p10), 1, %s2150_s28   ;;  %p408_p12 = scmp.lt.s32.totalorder (!%p344_p10), %s2162_s9, 1 }
  0x1c   : > { %2633 = sst [smem:[#allocation13_spill]] %s2294_s21  ;;  %s1737_s23 = sshll.u32 (!%p344_p10), %s2612_s22, 3 }
  0x1d   : > { %p412_p13 = scmp.lt.s32.totalorder (!%p344_p10), %s2158_s30, 1  ;;  %s2634_s0 = sld [smem:[#allocation14_spill]] (!%p344_p10) }
  0x1e   : > { %s2635_s1 = sld [smem:[#allocation15_spill]] (!%p344_p10)  ;;  %s2636_s2 = sld [smem:[#allocation16_spill]] (!%p344_p10) }
  0x1f   : > { %s2637_s3 = sld [smem:[#allocation17_spill]] (!%p344_p10)  ;;  %p1750_p0 = scmp.ne.s32.totalorder (!%p344_p10), %s2158_s30, 0 }
  0x20   : > { %s409_s24 = scalar_select %p408_p12, %s2162_s9, 1 }
  0x21   : > { %s2303_s25 = scalar_select %p412_p13, %s2158_s30, 1 }
  0x22   : > { %s1738_s26 = sshll.u32 %s409_s24, 3  ;;  %448 = sbr.rel (%p1750_p0) target bundleno = 42 (0x2a), region = 56  ;;  %vm450_vm0 = vcmask (!%p1750_p0), 261120  }
  0x23   : > { %s411_s19 = scalar_lea.vmem %s2634_s0, %s1738_s26  ;;  %s1786_s20 = sshll.u32 %s2303_s25, 4 }
  0x24   : > { %s2312_s11 = scalar_lea.vmem %s2635_s1, %s1786_s20  ;;  %s2317_s21 = scalar_lea.vmem %s2636_s2, %s1786_s20  ;;  %v449_v0 = vld [vmem:[%s411_s19] sm:$0xff] (!%p1750_p0) }
  0x25   : > { %s2322_s27 = scalar_lea.vmem %s2637_s3, %s1786_s20  ;;  %s2327_s26 = scalar_lea.vmem %s2605_s4, %s1786_s20 }
  0x26   : > { %s1790_s13 = sshll.u32 %s2303_s25, 6  ;;  %s1749_s14 = sshll.u32 %s2303_s25, 3 }
  0x27   : > { %s2334_s0 = scalar_lea.vmem %s2606_s5, %s1790_s13  ;;  %s2339_s1 = scalar_lea.vmem %s2607_s6, %s1749_s14 }
  0x28   : > { %s443_s2 = scalar_lea.vmem %s2608_s7, %s2303_s25  ;;  %s2345_s3 = scalar_lea.vmem [#allocation2], %s1737_s23 }
  0x29   : > { %451 = vst.msk [vmem:[%s2345_s3] sm:$0xff] %vm450_vm0, %v449_v0 }
  0x2a PF: > { %vm487_vm1 = vcmask 261120   ;;  %v2046_v8 = vld [vmem:[%s2317_s21] sm:$0xff]   ;;  %v2176_v9 = vmov 0.0   ;;  %v2047_v10 = vld [vmem:[%s2317_s21 + $0x8] sm:$0xff]   ;;  %vm2177_vm2 = vmmov 0   ;;  %vm575_vm3 = vcmask 1043456  }
  0x2b   : > { %1838 = vmatprep.subr.bf16.mxu0 %v2176_v9  ;;  %1864 = vmatprep.subr.bf16.mxu1 %v2176_v9  ;;  %v456_v11 = vld [vmem:[%s2312_s11 + $0x4] sm:$0xf]  ;;  %v502_v15 = vlaneseq  ;;  %v455_v26 = vld [vmem:[%s2312_s11] sm:$0xf]  ;;  %s2178_s30 = smov 120   ;;  %vm572_vm4 = vcmask 64512  }
  0x2c   : > { %1839 = vmatpush3.bf16.msra.mxu0 %v2046_v8  ;;  %1842 = vmatprep.mubr.msk.bf16.mxu0 %vm2177_vm2, %v2176_v9  ;;  %v731_v12 = vsel %vm575_vm3, %v456_v11, 0  ;;  %v2373_v19 = vld [vmem:[%s2339_s1] sm:$0xff]  ;;  %v577_v29 = vsel %vm575_vm3, %v455_v26, 0  ;;  %s2179_s1 = smov 112   ;;  %s2180_s12 = smov 104  }
  0x2d   : > { %1840 = vmatprep.subr.bf16.mxu0 %v2176_v9  ;;  %1866 = vmatprep.mubr.msk.bf16.mxu1 %vm2177_vm2, %v2176_v9  ;;  %v2369_v17 = vshrl.u32 %v502_v15, 7  ;;  %s2181_s24 = smov [#allocation2]  }
  0x2e   : > { %1865 = vmatpush3.bf16.msra.mxu1 %v731_v12 }
  0x2f   : > { %1876 = vmatprep.subr.bf16.mxu1 %v2176_v9  ;;  %v504_v18 = vsub.s32 0, %v2369_v17  ;;  %v509_v20 = vsub.s32 1, %v2369_v17  ;;  %v515_v32 = vsub.s32 4, %v2369_v17 }
  0x30   : > { %v2350_v1 = vld [vmem:[%s2345_s3] sm:$0xff]  ;;  %1841 = vmatpush3.bf16.msra.mxu0 %v2047_v10 }
  0x31   : > { %v488_v2 = vsel %vm487_vm1, %v2350_v1, 0.0  ;;  %1846 = vmatprep.subr.bf16.mxu0 %v2176_v9  ;;  %v505_v21 = vrot.slane %v2373_v19, %v504_v18  ;;  %v510_v23 = vrot.slane %v2373_v19, %v509_v20  ;;  %v516_v33 = vrot.slane %v2373_v19, %v515_v32 }
  0x32   : > { %489 = vadd.xlane.f32.xlu0 %v488_v2 }
  0xbf   : > { %v490_v3 = vpop.xlane.xlu0 %489 }
  0xc0   : > { %v492_v4 = vmul.f32 0.03125, %v490_v3 }
  0xc2   : > { %v493_v5 = vsub.f32 %v2350_v1, %v492_v4 }
  0xc4   : > { %v494_v6 = vmul.f32 %v493_v5, %v493_v5 }
  0xc6   : > { %v495_v7 = vsel %vm487_vm1, %v494_v6, 0.0 }
  0xc7   : > { %496 = vadd.xlane.f32.xlu0 %v495_v7 }
 0x154   : > { %v497_v13 = vpop.xlane.xlu0 %496 }
 0x155   : > { %v498_v14 = vmul.f32 0.03125, %v497_v13 }
 0x157   : > { %v499_v16 = vadd.f32 1e-05, %v498_v14 }
 0x159   : > { %2058 = vrsqrt.f32 %v499_v16 }
 0x163   : > { %v2059_v22 = vpop.eup %2058 }
 0x164   : > { %v501_v24 = vmul.f32 %v2059_v22, %v493_v5  ;;  %v464_v22 = vld [vmem:[%s2322_s27 + $0x4] sm:$0xf] }
 0x166   : > { %v506_v25 = vmul.f32 %v505_v21, %v501_v24 }
 0x168   : > { %v511_v27 = vadd.f32 %v510_v23, %v506_v25  ;;  %v884_v23 = vsel %vm575_vm3, %v464_v22, 0 }
 0x16a   : > { %v2379_v28 = vpack.c.bf16 %v511_v27, %v511_v27 }
 0x16c   : > { %725 = vrot.lane.b32.xlu1 %v2379_v28, %s2178_s30  ;;  %1843 = vmatmul.mubr.msk.bf16.vlgmr.msra.gmra.mrb[0].mxu0 %vm487_vm1, %v2379_v28  ;;  %v573_v30 = vsel %vm572_vm4, %v2379_v28, 0 }
 0x16d   : > { %1847 = vmatpush3.bf16.msra.mxu0 %v577_v29  ;;  %1848 = vmatprep.mubr.msk.bf16.mxu0 %vm2177_vm2, %v2176_v9  ;;  %v463_v29 = vld [vmem:[%s2322_s27] sm:$0xf] }
 0x16e   : > { %1852 = vmatprep.subr.bf16.mxu0 %v2176_v9  ;;  %v930_v32 = vsel %vm575_vm3, %v463_v29, 0 }
 0x174   : > { %1849 = vmatmul.mubr.msk.bf16.vlgmr.msra.gmra.mrb[4].mxu0 %vm572_vm4, %v2379_v28 }
 0x175   : > { %1854 = vmatprep.mubr.msk.bf16.mxu0 %vm2177_vm2, %v2176_v9 }
 0x176   : > { %1853 = vmatpush3.bf16.xpose.msra.mxu0 %v573_v30 }
 0x177   : > { %1858 = vmatprep.subr.bf16.mxu0 %v2176_v9 }
 0x1de   : > { %v726_v31 = vpop.permute.xlu1 %725 }
 0x1df   : > { %1867 = vmatmul.mubr.msk.bf16.vlgmr.msra.gmra.mrb[0].mxu1 %vm572_vm4, %v726_v31  ;;  %v728_v2 = vsel %vm572_vm4, %v726_v31, 0 }
 0x1e0   : > { %1878 = vmatprep.mubr.msk.bf16.mxu1 %vm2177_vm2, %v2176_v9 }
 0x23f   : > { %v566_v34 = vpop.f32.mrb[0].mxu0 }
 0x240   : > { %v1844_v35 = vpop.f32.mrb[1].mxu0  ;;  %v567_v37 = vadd.f32 %v566_v34, %v516_v33 }
 0x241   : > { %v569_v36 = vpop.f32.mrb[2].mxu0 }
 0x242   : > { %v1845_v38 = vpop.f32.mrb[3].mxu0  ;;  %v2401_v39 = vpack.c.bf16 %v567_v37, %v567_v37  ;;  %v457_v36 = vld [vmem:[%s2312_s11 + $0x8] sm:$0xf] }
 0x244   : > { %v681_v45 = vsel %vm575_vm3, %v2401_v39, 0 }
 0x247   : > { %v613_v40 = vpop.f32.mrb[4].mxu0 }
 0x248   : > { %v619_v41 = vpack.c.bf16 %v613_v40, %v613_v40  ;;  %v1850_v42 = vpop.f32.mrb[5].mxu0 }
 0x249   : > { %v616_v43 = vpop.f32.mrb[6].mxu0 }
 0x24a   : > { %v1851_v44 = vpop.f32.mrb[7].mxu0  ;;  %1855 = vmatmul.mubr.msk.bf16.vlgmr.msra.gmra.mrb[8].mxu0 %vm572_vm4, %v619_v41  ;;  %v978_v41 = vsel %vm575_vm3, %v457_v36, 0 }
 0x24b   : > { %1859 = vmatpush3.bf16.msra.mxu0 %v681_v45  ;;  %1860 = vmatprep.mubr.msk.bf16.mxu0 %vm2177_vm2, %v2176_v9 }
 0x24c   : > { %1870 = vmatprep.subr.bf16.mxu0 %v2176_v9 }
 0x2b2   : > { %v767_v46 = vpop.f32.mrb[0].mxu1 }
 0x2b3   : > { %v1868_v47 = vpop.f32.mrb[1].mxu1  ;;  %v773_v3 = vpack.c.bf16 %v767_v46, %v767_v46 }
 0x2b4   : > { %v770_v48 = vpop.f32.mrb[2].mxu1 }
 0x2b5   : > { %v1869_v49 = vpop.f32.mrb[3].mxu1 }
 0x31d   : > { %v657_v50 = vpop.f32.mrb[8].mxu0 }
 0x31e   : > { %v663_v51 = vmul.f32 0.35355338, %v657_v50  ;;  %v1856_v52 = vpop.f32.mrb[9].mxu0 }
 0x31f   : > { %v660_v53 = vpop.f32.mrb[10].mxu0 }
 0x320   : > { %v1857_v54 = vpop.f32.mrb[11].mxu0  ;;  %v664_v55 = vsel %vm572_vm4, %v663_v51, -inf }
 0x321   : > { %665 = vmax.xlane.f32.xlu1 %v664_v55 }
 0x332   : > { %972 = vrot.lane.b32.xlu1 %v2379_v28, %s2179_s1 }
 0x3ae   : > { %v666_v56 = vpop.xlane.xlu1 %665 }
 0x3af   : > { %v667_v57 = vsub.f32 %v663_v51, %v666_v56 }
 0x3b1   : > { %v668_v58 = vmul.f32 1.442695, %v667_v57 }
 0x3b2   : > { %v973_v33 = vpop.permute.xlu1 %972 }
 0x3b3   : > { %2060 = vpow2.f32 %v668_v58  ;;  %v975_v35 = vsel %vm572_vm4, %v973_v33, 0 }
 0x3bd   : > { %v2061_v59 = vpop.eup %2060 }
 0x3be   : > { %v670_v60 = vsel %vm572_vm4, %v2061_v59, 0.0 }
 0x3bf   : > { %671 = vadd.xlane.f32.xlu0 %v670_v60 }
 0x44c   : > { %v672_v61 = vpop.xlane.xlu0 %671 }
 0x44d   : > { %2062 = vrcp.f32 %v672_v61 }
 0x457   : > { %v2063_v62 = vpop.eup %2062 }
 0x458   : > { %v674_v63 = vmul.f32 %v2063_v62, %v2061_v59 }
 0x45a   : > { %v675_v0 = vpack.c.bf16 %v674_v63, %v674_v63 }
 0x45c   : > { %1861 = vmatmul.mubr.msk.bf16.vlgmr.msra.gmra.mrb[12].mxu0 %vm572_vm4, %v675_v0 }
 0x45d   : > { %1871 = vmatpush3.bf16.xpose.msra.mxu0 %v728_v2  ;;  %1872 = vmatprep.mubr.msk.bf16.mxu0 %vm2177_vm2, %v2176_v9 }
 0x45e   : > { %1882 = vmatprep.subr.bf16.mxu0 %v2176_v9 }
 0x464   : > { %1873 = vmatmul.mubr.msk.bf16.vlgmr.msra.gmra.mrb[16].mxu0 %vm572_vm4, %v773_v3 }
 0x465   : > { %1884 = vmatprep.mubr.msk.bf16.mxu0 %vm2177_vm2, %v2176_v9  ;;  %1883 = vmatpush3.bf16.msra.mxu0 %v884_v23 }
 0x466   : > { %1894 = vmatprep.subr.bf16.mxu0 %v2176_v9 }
 0x52f   : > { %v717_v4 = vpop.f32.mrb[12].mxu0 }
 0x530   : > { %v1862_v5 = vpop.f32.mrb[13].mxu0  ;;  %v723_v34 = vpack.c.bf16 %v717_v4, %v717_v4 }
 0x531   : > { %v720_v6 = vpop.f32.mrb[14].mxu0 }
 0x532   : > { %v1863_v7 = vpop.f32.mrb[15].mxu0 }
 0x537   : > { %v811_v8 = vpop.f32.mrb[16].mxu0 }
 0x538   : > { %v817_v10 = vmul.f32 0.35355338, %v811_v8  ;;  %v1874_v11 = vpop.f32.mrb[17].mxu0  ;;  %v465_v8 = vld [vmem:[%s2322_s27 + $0x8] sm:$0xf] }
 0x539   : > { %v814_v12 = vpop.f32.mrb[18].mxu0 }
 0x53a   : > { %v1875_v13 = vpop.f32.mrb[19].mxu0  ;;  %v818_v14 = vsel %vm572_vm4, %v817_v10, -inf }
 0x53b   : > { %819 = vmax.xlane.f32.xlu0 %v818_v14  ;;  %v458_v13 = vld [vmem:[%s2312_s11 + $0xc] sm:$0xf] }
 0x5c8   : > { %v820_v15 = vpop.xlane.xlu0 %819 }
 0x5c9   : > { %v821_v16 = vsub.f32 %v817_v10, %v820_v15  ;;  %v1130_v10 = vsel %vm575_vm3, %v465_v8, 0 }
 0x5cb   : > { %v822_v18 = vmul.f32 1.442695, %v821_v16  ;;  %v1179_v16 = vsel %vm575_vm3, %v458_v13, 0  ;;  %v2048_v13 = vld [vmem:[%s2327_s26] sm:$0xff]  }
 0x5cd   : > { %2064 = vpow2.f32 %v822_v18 }
 0x5d7   : > { %v2065_v20 = vpop.eup %2064 }
 0x5d8   : > { %v824_v21 = vsel %vm572_vm4, %v2065_v20, 0.0 }
 0x5d9   : > { %825 = vadd.xlane.f32.xlu0 %v824_v21 }
 0x5ef   : > { %831 = vrot.lane.b32.xlu0 %v2401_v39, %s2178_s30 }
 0x666   : > { %v826_v24 = vpop.xlane.xlu0 %825 }
 0x667   : > { %2066 = vrcp.f32 %v826_v24 }
 0x66a   : > { %v832_v25 = vpop.permute.xlu0 %831 }
 0x66b   : > { %v837_v26 = vsel %vm575_vm3, %v832_v25, 0 }
 0x66c   : > { %1877 = vmatpush3.bf16.msra.mxu1 %v837_v26 }
 0x66d   : > { %1888 = vmatprep.subr.bf16.mxu1 %v2176_v9 }
 0x671   : > { %v2067_v27 = vpop.eup %2066 }
 0x672   : > { %v828_v30 = vmul.f32 %v2067_v27, %v2065_v20 }
 0x674   : > { %v829_v31 = vpack.c.bf16 %v828_v30, %v828_v30 }
 0x676   : > { %1879 = vmatmul.mubr.msk.bf16.vlgmr.msra.gmra.mrb[4].mxu1 %vm572_vm4, %v829_v31 }
 0x677   : > { %1889 = vmatpush3.bf16.msra.mxu1 %v930_v32  ;;  %1890 = vmatprep.mubr.msk.bf16.mxu1 %vm2177_vm2, %v2176_v9 }
 0x678   : > { %1900 = vmatprep.subr.bf16.mxu1 %v2176_v9 }
 0x67e   : > { %1891 = vmatmul.mubr.msk.bf16.vlgmr.msra.gmra.mrb[8].mxu1 %vm572_vm4, %v723_v34 }
 0x67f   : > { %1902 = vmatprep.mubr.msk.bf16.mxu1 %vm2177_vm2, %v2176_v9 }
 0x680   : > { %1901 = vmatpush3.bf16.xpose.msra.mxu1 %v975_v35 }
 0x681   : > { %1912 = vmatprep.subr.bf16.mxu1 %v2176_v9 }
 0x749   : > { %v873_v37 = vpop.f32.mrb[4].mxu1 }
 0x74a   : > { %v879_v38 = vpack.c.bf16 %v873_v37, %v873_v37  ;;  %v1880_v40 = vpop.f32.mrb[5].mxu1 }
 0x74b   : > { %v876_v42 = vpop.f32.mrb[6].mxu1 }
 0x74c   : > { %v1881_v43 = vpop.f32.mrb[7].mxu1  ;;  %1885 = vmatmul.mubr.msk.bf16.vlgmr.msra.gmra.mrb[20].mxu0 %vm572_vm4, %v879_v38 }
 0x74d   : > { %1895 = vmatpush3.bf16.msra.mxu0 %v978_v41  ;;  %1896 = vmatprep.mubr.msk.bf16.mxu0 %vm2177_vm2, %v2176_v9 }
 0x74e   : > { %1906 = vmatprep.subr.bf16.mxu0 %v2176_v9 }
 0x751   : > { %v966_v44 = vpop.f32.mrb[8].mxu1 }
 0x752   : > { %v1892_v45 = vpop.f32.mrb[9].mxu1 }
 0x753   : > { %v969_v46 = vpop.f32.mrb[10].mxu1 }
 0x754   : > { %v1893_v47 = vpop.f32.mrb[11].mxu1  ;;  %1897 = vmatmul.mubr.msk.bf16.vlgmr.msra.gmra.mrb[24].mxu0 %vm572_vm4, %v973_v33 }
 0x755   : > { %1908 = vmatprep.mubr.msk.bf16.mxu0 %vm2177_vm2, %v2176_v9 }
 0x81f   : > { %v920_v48 = vpop.f32.mrb[20].mxu0 }
 0x820   : > { %v2450_v49 = vadd.f32 %v966_v44, %v920_v48  ;;  %v1886_v50 = vpop.f32.mrb[21].mxu0 }
 0x821   : > { %v923_v51 = vpop.f32.mrb[22].mxu0  ;;  %v466_v50 = vld [vmem:[%s2322_s27 + $0xc] sm:$0xf] }
 0x822   : > { %v1887_v52 = vpop.f32.mrb[23].mxu0  ;;  %v1331_v51 = vsel %vm575_vm3, %v466_v50, 0 }
 0x827   : > { %v1014_v53 = vpop.f32.mrb[24].mxu0 }
 0x828   : > { %v1020_v54 = vpack.c.bf16 %v1014_v53, %v1014_v53  ;;  %v1898_v55 = vpop.f32.mrb[25].mxu0 }
 0x829   : > { %v1017_v56 = vpop.f32.mrb[26].mxu0 }
 0x82a   : > { %v1899_v57 = vpop.f32.mrb[27].mxu0  ;;  %1903 = vmatmul.mubr.msk.bf16.vlgmr.msra.gmra.mrb[12].mxu1 %vm572_vm4, %v1020_v54 }
 0x82b   : > { %1914 = vmatprep.mubr.msk.bf16.mxu1 %vm2177_vm2, %v2176_v9  ;;  %1913 = vmatpush3.bf16.msra.mxu1 %v1130_v10 }
 0x82c   : > { %1924 = vmatprep.subr.bf16.mxu1 %v2176_v9 }
 0x8fd   : > { %v1058_v58 = vpop.f32.mrb[12].mxu1 }
 0x8fe   : > { %v1064_v59 = vmul.f32 0.35355338, %v1058_v58  ;;  %v1904_v60 = vpop.f32.mrb[13].mxu1 }
 0x8ff   : > { %v1061_v61 = vpop.f32.mrb[14].mxu1  ;;  %v1376_v60 = vsub.s32 5, %v2369_v17 }
 0x900   : > { %v1905_v62 = vpop.f32.mrb[15].mxu1  ;;  %v1065_v63 = vsel %vm572_vm4, %v1064_v59, -inf }
 0x901   : > { %1066 = vmax.xlane.f32.xlu0 %v1065_v63  ;;  %v1377_v61 = vrot.slane %v2373_v19, %v1376_v60 }
 0x917   : > { %1077 = vrot.lane.b32.xlu0 %v2401_v39, %s2179_s1 }
 0x98e   : > { %v1067_v0 = vpop.xlane.xlu0 %1066 }
 0x98f   : > { %v1068_v2 = vsub.f32 %v1064_v59, %v1067_v0 }
 0x991   : > { %v1069_v3 = vmul.f32 1.442695, %v1068_v2 }
 0x992   : > { %v1078_v4 = vpop.permute.xlu0 %1077 }
 0x993   : > { %2068 = vpow2.f32 %v1069_v3  ;;  %v1083_v5 = vsel %vm575_vm3, %v1078_v4, 0 }
 0x994   : > { %1907 = vmatpush3.bf16.msra.mxu0 %v1083_v5 }
 0x995   : > { %1918 = vmatprep.subr.bf16.mxu0 %v2176_v9 }
 0x99d   : > { %v2069_v6 = vpop.eup %2068 }
 0x99e   : > { %v1071_v7 = vsel %vm572_vm4, %v2069_v6, 0.0 }
 0x99f   : > { %1072 = vadd.xlane.f32.xlu1 %v1071_v7 }
 0x9b0   : > { %1173 = vrot.lane.b32.xlu1 %v2379_v28, %s2180_s12 }
 0xa2c   : > { %v1073_v11 = vpop.xlane.xlu1 %1072 }
 0xa2d   : > { %2070 = vrcp.f32 %v1073_v11 }
 0xa30   : > { %v1174_v28 = vpop.permute.xlu1 %1173 }
 0xa31   : > { %v1176_v23 = vsel %vm572_vm4, %v1174_v28, 0 }
 0xa37   : > { %v2071_v12 = vpop.eup %2070 }
 0xa38   : > { %v1075_v14 = vmul.f32 %v2071_v12, %v2069_v6 }
 0xa3a   : > { %v1076_v15 = vpack.c.bf16 %v1075_v14, %v1075_v14  ;;  %v2049_v14 = vld [vmem:[%s2327_s26 + $0x8] sm:$0xff]   ;;  %s2084_s26 = sshll.u32 %s2181_s24, 4  ;;  %s2085_s26 = int_to_ptr.vmem [resolvable:$false] %s2084_s26 }
 0xa3b   : > { %s2086_s13 = scalar_lea.vmem %s2085_s26, 256 }
 0xa3c   : > { %1909 = vmatmul.mubr.msk.bf16.vlgmr.msra.gmra.mrb[28].mxu0 %vm572_vm4, %v1076_v15  ;;  %v2051_v15 = vld [vmem:[%s2334_s0 + $0x8] sm:$0xff]  }
 0xa3d   : > { %1919 = vmatpush3.bf16.msra.mxu0 %v1179_v16  ;;  %1920 = vmatprep.mubr.msk.bf16.mxu0 %vm2177_vm2, %v2176_v9  ;;  %v2052_v16 = vld [vmem:[%s2334_s0 + $0x10] sm:$0xff]  }
 0xa3e   : > { %1930 = vmatprep.subr.bf16.mxu0 %v2176_v9 }
 0xa44   : > { %1921 = vmatmul.mubr.msk.bf16.vlgmr.msra.gmra.mrb[32].mxu0 %vm572_vm4, %v1174_v28 }
 0xa45   : > { %1932 = vmatprep.mubr.msk.bf16.mxu0 %vm2177_vm2, %v2176_v9 }
 0xb0f   : > { %v1119_v18 = vpop.f32.mrb[28].mxu0 }
 0xb10   : > { %v1125_v20 = vpack.c.bf16 %v1119_v18, %v1119_v18  ;;  %v1910_v21 = vpop.f32.mrb[29].mxu0 }
 0xb11   : > { %v1122_v22 = vpop.f32.mrb[30].mxu0  ;;  %v1395_v21 = vsub.s32 2, %v2369_v17 }
 0xb12   : > { %v1911_v24 = vpop.f32.mrb[31].mxu0  ;;  %1915 = vmatmul.mubr.msk.bf16.vlgmr.msra.gmra.mrb[16].mxu1 %vm572_vm4, %v1125_v20  ;;  %v1400_v22 = vsub.s32 3, %v2369_v17 }
 0xb13   : > { %1925 = vmatpush3.bf16.xpose.msra.mxu1 %v1176_v23  ;;  %1926 = vmatprep.mubr.msk.bf16.mxu1 %vm2177_vm2, %v2176_v9  ;;  %v1396_v23 = vrot.slane %v2373_v19, %v1395_v21 }
 0xb14   : > { %1936 = vmatprep.subr.bf16.mxu1 %v2176_v9 }
 0xb17   : > { %v1215_v25 = vpop.f32.mrb[32].mxu0 }
 0xb18   : > { %v1221_v26 = vpack.c.bf16 %v1215_v25, %v1215_v25  ;;  %v1922_v27 = vpop.f32.mrb[33].mxu0 }
 0xb19   : > { %v1218_v29 = vpop.f32.mrb[34].mxu0 }
 0xb1a   : > { %v1923_v30 = vpop.f32.mrb[35].mxu0  ;;  %1927 = vmatmul.mubr.msk.bf16.vlgmr.msra.gmra.mrb[20].mxu1 %vm572_vm4, %v1221_v26  ;;  %v1401_v26 = vrot.slane %v2373_v19, %v1400_v22 }
 0xb1b   : > { %1938 = vmatprep.mubr.msk.bf16.mxu1 %vm2177_vm2, %v2176_v9  ;;  %1937 = vmatpush3.bf16.msra.mxu1 %v1331_v51 }
 0xb1c   : > { %1950 = vmatprep.subr.bf16.mxu1 %v2176_v9 }
 0xbe5   : > { %v1166_v31 = vpop.f32.mrb[16].mxu1 }
 0xbe6   : > { %v1172_v32 = vadd.f32 %v1166_v31, %v2450_v49  ;;  %v1916_v33 = vpop.f32.mrb[17].mxu1  ;;  %v2053_v31 = vld [vmem:[%s2334_s0 + $0x18] sm:$0xff]  }
 0xbe7   : > { %v1169_v34 = vpop.f32.mrb[18].mxu1  ;;  %v2055_v33 = vld [vmem:[%s2334_s0 + $0x28] sm:$0xff]  }
 0xbe8   : > { %v1917_v35 = vpop.f32.mrb[19].mxu1  ;;  %v2056_v34 = vld [vmem:[%s2334_s0 + $0x30] sm:$0xff]  }
 0xbe9   : > { %v2057_v35 = vld [vmem:[%s2334_s0 + $0x38] sm:$0xff]  }
 0xbed   : > { %v1259_v36 = vpop.f32.mrb[20].mxu1 }
 0xbee   : > { %v1265_v37 = vmul.f32 0.35355338, %v1259_v36  ;;  %v1928_v38 = vpop.f32.mrb[21].mxu1  ;;  %v1770_v36 = vld [vmem:[%s443_s2] ss:$0 sm:$0xff]  ;;  %s1581_s2 = sshll.u32 %s2345_s3, 4  ;;  %s2546_s2 = int_to_ptr.vmem [resolvable:$true] %s1581_s2 }
 0xbef   : > { %v1262_v40 = vpop.f32.mrb[22].mxu1  ;;  %s2080_s20 = scalar_lea.vmem %s2546_s2, 128  ;;  %p2087_p5 = scmp.lt.s32.totalorder %s2546_s2, %s2085_s26 }
 0xbf0   : > { %v1929_v41 = vpop.f32.mrb[23].mxu1  ;;  %v1266_v42 = vsel %vm572_vm4, %v1265_v37, -inf  ;;  %p2081_p1 = scmp.ne.s32.totalorder %s2546_s2, %s2080_s20  ;;  %p2088_p6 = scmp.lt.s32.totalorder %s2086_s13, %s2080_s20 }
 0xbf1   : > { %1267 = vmax.xlane.f32.xlu0 %v1266_v42 }
 0xbf2   : > { %p2082_p2 = pnand %p2081_p1, %p2276_p3  ;;  %p2089_p7 = por %p2088_p6, %p2087_p5 }
 0xbf4   : > { %p2083_p4 = pneg %p2082_p2 }
 0xbf6   : > { %p2090_p8 = pnand %p2089_p7, %p2083_p4 }
 0xc07   : > { %1278 = vrot.lane.b32.xlu0 %v2401_v39, %s2180_s12 }
 0xc7e   : > { %v1268_v43 = vpop.xlane.xlu0 %1267 }
 0xc7f   : > { %v1269_v44 = vsub.f32 %v1265_v37, %v1268_v43 }
 0xc81   : > { %v1270_v45 = vmul.f32 1.442695, %v1269_v44 }
 0xc82   : > { %v1279_v46 = vpop.permute.xlu0 %1278 }
 0xc83   : > { %2072 = vpow2.f32 %v1270_v45  ;;  %v1284_v47 = vsel %vm575_vm3, %v1279_v46, 0 }
 0xc84   : > { %1931 = vmatpush3.bf16.msra.mxu0 %v1284_v47 }
 0xc85   : > { %1942 = vmatprep.subr.bf16.mxu0 %v2176_v9 }
 0xc8d   : > { %v2073_v48 = vpop.eup %2072 }
 0xc8e   : > { %v1272_v49 = vsel %vm572_vm4, %v2073_v48, 0.0 }
 0xc8f   : > { %1273 = vadd.xlane.f32.xlu1 %v1272_v49 }
 0xd1c   : > { %v1274_v39 = vpop.xlane.xlu1 %1273 }
 0xd1d   : > { %2074 = vrcp.f32 %v1274_v39 }
 0xd27   : > { %v2075_v52 = vpop.eup %2074 }
 0xd28   : > { %v1276_v53 = vmul.f32 %v2075_v52, %v2073_v48  ;;  %v1405_v48 = vsub.s32 6, %v2369_v17 }
 0xd2a   : > { %v1277_v54 = vpack.c.bf16 %v1276_v53, %v1276_v53  ;;  %v1406_v49 = vrot.slane %v2373_v19, %v1405_v48 }
 0xd2c   : > { %1933 = vmatmul.mubr.msk.bf16.vlgmr.msra.gmra.mrb[36].mxu0 %vm572_vm4, %v1277_v54 }
 0xd2d   : > { %1946 = vmatprep.mubr.msk.bf16.mxu0 %vm2177_vm2, %v2176_v9  ;;  %1943 = vmatpush3.bf16.msra.mxu0 %v2048_v13 }
 0xd2e   : > { %1944 = vmatprep.subr.bf16.mxu0 %v2176_v9 }
 0xd31   : > { %1945 = vmatpush3.bf16.msra.mxu0 %v2049_v14 }
 0xdff   : > { %v1320_v55 = vpop.f32.mrb[36].mxu0 }
 0xe00   : > { %v1326_v56 = vpack.c.bf16 %v1320_v55, %v1320_v55  ;;  %v1934_v57 = vpop.f32.mrb[37].mxu0 }
 0xe01   : > { %v1323_v58 = vpop.f32.mrb[38].mxu0 }
 0xe02   : > { %v1935_v59 = vpop.f32.mrb[39].mxu0  ;;  %1939 = vmatmul.mubr.msk.bf16.vlgmr.msra.gmra.mrb[24].mxu1 %vm572_vm4, %v1326_v56 }
 0xe03   : > { %1966 = vmatprep.mubr.msk.bf16.mxu1 %vm2177_vm2, %v2176_v9 }
 0xed5   : > { %v1367_v62 = vpop.f32.mrb[24].mxu1 }
 0xed6   : > { %v1373_v63 = vadd.f32 %v1367_v62, %v1172_v32  ;;  %v1940_v0 = vpop.f32.mrb[25].mxu1  ;;  %v2054_v32 = vld [vmem:[%s2334_s0 + $0x20] sm:$0xff]  }
 0xed7   : > { %v1370_v2 = vpop.f32.mrb[26].mxu1 }
 0xed8   : > { %v1378_v3 = vadd.f32 %v1377_v61, %v1373_v63  ;;  %v1941_v4 = vpop.f32.mrb[27].mxu1 }
 0xeda   : > { %v2502_v5 = vadd.f32 %v1378_v3, %v2350_v1  ;;  %v2050_v1 = vld [vmem:[%s2334_s0] sm:$0xff]   ;;  %s1783_s0 = sshll.u32 %s2162_s9, 7  ;;  %s2638_s9 = sand.u32 1, %s2150_s28  }
 0xedb   : > { %1951 = vmatpush3.bf16.msra.mxu1 %v2050_v1  ;;  %s2544_s25 = scalar_lea.hbm %s2609_s8, %s1783_s0  ;;  %s1568_s19 = scalar_lea.sflag [#allocation3], %s2638_s9 }
 0xedc   : > { %v1380_v6 = vsel %vm487_vm1, %v2502_v5, 0.0  ;;  %1952 = vmatprep.subr.bf16.mxu1 %v2176_v9  ;;  %v1407_v50 = vadd.f32 %v1406_v49, %v2502_v5 }
 0xedd   : > { %1381 = vadd.xlane.f32.xlu1 %v1380_v6 }
 0xedf   : > { %1953 = vmatpush3.bf16.msra.mxu1 %v2051_v15 }
 0xee0   : > { %1954 = vmatprep.subr.bf16.mxu1 %v2176_v9 }
 0xee3   : > { %1955 = vmatpush3.bf16.msra.mxu1 %v2052_v16 }
 0xee4   : > { %1956 = vmatprep.subr.bf16.mxu1 %v2176_v9 }
 0xee7   : > { %1957 = vmatpush3.bf16.msra.mxu1 %v2053_v31 }
 0xee8   : > { %1958 = vmatprep.subr.bf16.mxu1 %v2176_v9 }
 0xeeb   : > { %1959 = vmatpush3.bf16.msra.mxu1 %v2054_v32 }
 0xeec   : > { %1960 = vmatprep.subr.bf16.mxu1 %v2176_v9 }
 0xeef   : > { %1961 = vmatpush3.bf16.msra.mxu1 %v2055_v33 }
 0xef0   : > { %1962 = vmatprep.subr.bf16.mxu1 %v2176_v9 }
 0xef3   : > { %1963 = vmatpush3.bf16.msra.mxu1 %v2056_v34 }
 0xef4   : > { %1964 = vmatprep.subr.bf16.mxu1 %v2176_v9 }
 0xef7   : > { %1965 = vmatpush3.bf16.msra.mxu1 %v2057_v35 }
 0xf6a   : > { %v1382_v7 = vpop.xlane.xlu1 %1381 }
 0xf6b   : > { %v1383_v8 = vmul.f32 0.03125, %v1382_v7 }
 0xf6d   : > { %v1384_v10 = vsub.f32 %v2502_v5, %v1383_v8 }
 0xf6f   : > { %v1385_v11 = vmul.f32 %v1384_v10, %v1384_v10 }
 0xf71   : > { %v1386_v12 = vsel %vm487_vm1, %v1385_v11, 0.0 }
 0xf72   : > { %1387 = vadd.xlane.f32.xlu0 %v1386_v12 }
 0xfff   : > { %v1388_v28 = vpop.xlane.xlu0 %1387 }
0x1000   : > { %v1389_v18 = vmul.f32 0.03125, %v1388_v28 }
0x1002   : > { %v1390_v20 = vadd.f32 1e-05, %v1389_v18 }
0x1004   : > { %2076 = vrsqrt.f32 %v1390_v20 }
0x100e   : > { %v2077_v24 = vpop.eup %2076 }
0x100f   : > { %v1392_v25 = vmul.f32 %v2077_v24, %v1384_v10 }
0x1011   : > { %v1397_v27 = vmul.f32 %v1396_v23, %v1392_v25 }
0x1013   : > { %v1402_v29 = vadd.f32 %v1401_v26, %v1397_v27 }
0x1015   : > { %v1408_v30 = vpack.c.bf16 %v1402_v29, %v1402_v29 }
0x1017   : > { %1947 = vmatmul.mubr.msk.bf16.vlgmr.msra.gmra.mrb[40].mxu0 %vm487_vm1, %v1408_v30 }
0x10ea   : > { %v1464_v37 = vpop.f32.mrb[40].mxu0 }
0x10eb   : > { %v1465_v38 = vadd.f32 %v1770_v36, %v1464_v37  ;;  %v1948_v40 = vpop.f32.mrb[41].mxu0 }
0x10ec   : > { %v1467_v41 = vpop.f32.mrb[42].mxu0 }
0x10ed   : > { %v1472_v42 = vmul.f32 0.70710677, %v1465_v38  ;;  %v1949_v43 = vpop.f32.mrb[43].mxu0  ;;  %v1470_v45 = vmul.f32 0.5, %v1465_v38 }
0x10ef   : > { %2078 = verf.f32 %v1472_v42 }
0x10f9   : > { %v2079_v44 = vpop.eup %2078 }
0x10fa   : > { %v1474_v9 = vadd.f32 1.0, %v2079_v44 }
0x10fc   : > { %v1475_v46 = vmul.f32 %v1474_v9, %v1470_v45 }
0x10fe   : > { %v1476_v47 = vpack.c.bf16 %v1475_v46, %v1475_v46 }
0x1100   : > { %1967 = vmatmul.mubr.bf16.vlgmr.msra.gmra.mrb[28].mxu1 %v1476_v47 }
0x11d3   : > { %v1559_v51 = vpop.f32.mrb[28].mxu1 }
0x11d4   : > { %v1565_v39 = vadd.f32 %v1559_v51, %v1407_v50  ;;  %v1968_v52 = vpop.f32.mrb[29].mxu1 }
0x11d5   : > { %v1562_v17 = vpop.f32.mrb[30].mxu1 }
0x11d6   : > { %1566 = vst.msk [vmem:[%s2345_s3] sm:$0xff] %vm487_vm1, %v1565_v39  ;;  %v1969_v19 = vpop.f32.mrb[31].mxu1 }
0x11d7   : > { %2093 = shalt.err (!%p2090_p8)
}
0x11d8   : > { %s2094_s3 = scalar_lea.hbm %s2544_s25, 128  ;;  %s2098_s16 = scalar_lea.hbm %s2609_s8, 256 }
0x11d9   : > { %p2095_p10 = scmp.ne.s32.totalorder %s2544_s25, %s2094_s3  ;;  %p2099_p13 = scmp.lt.u32.totalorder %s2544_s25, %s2609_s8 }
0x11da   : > { %p2100_p0 = scmp.lt.u32.totalorder %s2098_s16, %s2094_s3  ;;  %p2102_p2 = scmp.lt.u32.totalorder %s2094_s3, %s2544_s25 }
0x11db   : > { %p2096_p11 = pnand %p2095_p10, %p2276_p3 }
0x11dc   : > { %p2101_p1 = por %p2100_p0, %p2099_p13 }
0x11dd   : > { %p2097_p12 = pneg %p2096_p11 }
0x11de   : > { %p2103_p4 = por %p2102_p2, %p2101_p1 }
0x11e0   : > { %p2104_p5 = pnand %p2103_p4, %p2097_p12 }
0x11e2   : > { %2107 = shalt.err (!%p2104_p5)
}
0x11e3   : > { %1970 = dma.vmem_to_hbm [thread:$0]  (%p2276_p3), %s2546_s2, 128, %s2544_s25, %s1568_s19  }
0x11e4 PF: > { %s2639_s29 = sld [smem:[#allocation9_spill]]  ;;  %s2640_s18 = sld [smem:[#allocation5_spill]] }
0x11ea   : > { %p1976_p6 = scmp.ge.s32.totalorder %s2639_s29, 2  ;;  %s1593_s1 = sand.u32 1, %s2640_s18  }
0x11eb   : > { %s1594_s12 = scalar_lea.sflag [#allocation3], %s1593_s1 }
0x11ec   : > { %p1973_p7 = pnand %p1976_p6, %p2286_p9 }
0x11ee   : > { %2141 = dma.done.wait (!%p1973_p7), %s1594_s12, 128  }
0x11ef   : > { %2143 = vsyncadd (!%p1973_p7), %s1594_s12, 4294967168  ;;  %s21_s12 = sadd.s32 1, %s2639_s29   ;;  %s2642_s11 = sld [smem:[#allocation6_spill]] }
0x11f0   : > { %p18_p8 = scmp.ge.s32.totalorder %s21_s12, 6   ;;  %s2643_s29 = sld [smem:[#allocation13_spill]] }
0x11f1   : > { %s2644_s30 = sld [smem:[#allocation7_spill]]  ;;  %s2645_s9 = sld [smem:[#allocation8_spill]] }
0x11f2   : > { %s2646_s10 = sld [smem:[#allocation10_spill]]  ;;  %s2647_s17 = sld [smem:[#allocation11_spill]] }
0x11f3   : > { %s2648_s27 = smov %s2150_s28  ;;  %20 = sbr.rel (!%p18_p8) target bundleno = 10 (0xa), region = 112 }
0x11f5   : > { %s2649_s28 = smov %s2642_s11 }
0x11f8   : > { %s2650_s11 = smov %s2647_s17 }
0x11fa   :  { %1599 = vsyncpa [#allocation3], 1 }
0x11fb   :  { %1601 = vsyncpa [#allocation3 + $0x1], 1 }

</bundles_post_ra>
